<compile_context>
chip_gen: v6e
topology: v6e:2x2x1
jax: 0.10.0
libtpu: 0.0.40
codegen_flags: <defaults>
</compile_context>

<pallas_src>
import functools
import math

import jax
import jax.numpy as jnp
from jax.experimental import pallas as pl
from jax.experimental.pallas import tpu as pltpu


def _round_up(v, m):
    return ((v + m - 1) // m) * m


# ----------------------------------------------------------------------------
# Pallas kernels (CM layout: refs are (channels, tile_of_positions))
# ----------------------------------------------------------------------------
def _gx_stats_kernel(g_ref, x_ref, wg_ref, wx_ref, b_ref, st_ref, *, m_true, tm):
    """Partial per-channel (sum, sum^2) of g1 = Wg@g+bg and x1 = Wx@x+bx."""
    i = pl.program_id(0)
    cols = jax.lax.broadcasted_iota(jnp.int32, (1, tm), 1) + i * tm
    mask = cols < m_true                                   # mask padded columns

    g1 = jnp.dot(wg_ref[...], g_ref[...].astype(jnp.bfloat16),
                 preferred_element_type=jnp.float32) + b_ref[:, 0:1]
    x1 = jnp.dot(wx_ref[...], x_ref[...].astype(jnp.bfloat16),
                 preferred_element_type=jnp.float32) + b_ref[:, 1:2]
    g1 = jnp.where(mask, g1, 0.0)
    x1 = jnp.where(mask, x1, 0.0)

    f_int = b_ref.shape[0]
    st_ref[0] = jnp.concatenate(
        [jnp.sum(g1, axis=1, keepdims=True),
         jnp.sum(g1 * g1, axis=1, keepdims=True),
         jnp.sum(x1, axis=1, keepdims=True),
         jnp.sum(x1 * x1, axis=1, keepdims=True),
         jnp.zeros((f_int, 4), jnp.float32)], axis=1)


def _gate_logit_kernel(g_ref, x_ref, wg_ref, wx_ref, aff_ref, p_ref, pst_ref,
                       *, m_true, tm):
    """p = Wpsi @ relu(BN(Wg@g+bg) + BN(Wx@x+bx)) + bpsi, plus partial stats of p.

    aff_ref columns: 0=bg 1=bx 2=scale_g 3=shift_g 4=scale_x 5=shift_x
                     6=wpsi 7=bpsi(broadcast)
    """
    i = pl.program_id(0)
    cols = jax.lax.broadcasted_iota(jnp.int32, (1, tm), 1) + i * tm
    mask = cols < m_true

    g1 = jnp.dot(wg_ref[...], g_ref[...].astype(jnp.bfloat16),
                 preferred_element_type=jnp.float32) + aff_ref[:, 0:1]
    x1 = jnp.dot(wx_ref[...], x_ref[...].astype(jnp.bfloat16),
                 preferred_element_type=jnp.float32) + aff_ref[:, 1:2]
    g1 = g1 * aff_ref[:, 2:3] + aff_ref[:, 3:4]            # folded BatchNorm (f32)
    x1 = x1 * aff_ref[:, 4:5] + aff_ref[:, 5:6]
    s = jnp.maximum(g1 + x1, 0.0)                          # ReLU

    # psi 1x1 conv (Cout=1) as an f32 sublane reduction -> lane-dense (1, tm)
    p = jnp.sum(s * aff_ref[:, 6:7], axis=0, keepdims=True) + aff_ref[0:1, 7:8]
    p_ref[...] = p

    pm = jnp.where(mask, p, 0.0)
    pst_ref[0] = jnp.concatenate(
        [jnp.sum(pm, axis=1, keepdims=True),
         jnp.sum(pm * pm, axis=1, keepdims=True),
         jnp.zeros((1, 6), jnp.float32)], axis=1)


def _apply_gate_kernel(x_ref, p_ref, sc_ref, o_ref):
    """out = x * sigmoid(scale_p * p + shift_p)   (psi BN folded into scale/shift)."""
    psi = jax.nn.sigmoid(p_ref[...] * sc_ref[0:1, 0:1] + sc_ref[0:1, 1:2])
    o_ref[...] = x_ref[...] * psi


# ----------------------------------------------------------------------------
# Forward pass
# ----------------------------------------------------------------------------
def attention_block_forward(params, g_nchw, x_nchw, *, eps=1e-5, tm_cap=1024):
    n, f_l, h, w = g_nchw.shape
    _, f_g, _, _ = x_nchw.shape
    f_int = params["wg_w"].shape[0]
    m = n * h * w

    # adaptive lane tile: multiple of 128, capped, minimal padding
    ntiles = pl.cdiv(m, tm_cap)
    tm = _round_up(pl.cdiv(m, ntiles), 128)
    mp = ntiles * tm

    # NCHW -> (C, N*H*W) "CM" layout; pad positions once, reused by all passes
    g_cm = jnp.transpose(g_nchw, (1, 0, 2, 3)).reshape(f_l, m).astype(jnp.float32)
    x_cm = jnp.transpose(x_nchw, (1, 0, 2, 3)).reshape(f_g, m).astype(jnp.float32)
    if mp != m:
        g_cm = jnp.pad(g_cm, ((0, 0), (0, mp - m)))
        x_cm = jnp.pad(x_cm, ((0, 0), (0, mp - m)))

    wg = params["wg_w"].reshape(f_int, f_l).astype(jnp.bfloat16)
    wx = params["wx_w"].reshape(f_int, f_g).astype(jnp.bfloat16)
    bg = params["wg_b"].astype(jnp.float32)
    bx = params["wx_b"].astype(jnp.float32)

    parallel = pltpu.CompilerParams(dimension_semantics=("parallel",))

    # ---- pass 1: batch statistics of g1 and x1 -----------------------------
    bias_pack = jnp.pad(jnp.stack([bg, bx], axis=1), ((0, 0), (0, 6)))
    stats = pl.pallas_call(
        functools.partial(_gx_stats_kernel, m_true=m, tm=tm),
        out_shape=jax.ShapeDtypeStruct((ntiles, f_int, 8), jnp.float32),
        grid=(ntiles,),
        in_specs=[
            pl.BlockSpec((f_l, tm), lambda i: (0, i)),
            pl.BlockSpec((f_g, tm), lambda i: (0, i)),
            pl.BlockSpec((f_int, f_l), lambda i: (0, 0)),
            pl.BlockSpec((f_int, f_g), lambda i: (0, 0)),
            pl.BlockSpec((f_int, 8), lambda i: (0, 0)),
        ],
        out_specs=pl.BlockSpec((1, f_int, 8), lambda i: (i, 0, 0)),
        compiler_params=parallel,
    )(g_cm, x_cm, wg, wx, bias_pack)

    st = jnp.sum(stats, axis=0)                       # tiny (f_int, 8) combine
    mean_g, mean_x = st[:, 0] / m, st[:, 2] / m
    var_g = jnp.maximum(st[:, 1] / m - mean_g * mean_g, 0.0)
    var_x = jnp.maximum(st[:, 3] / m - mean_x * mean_x, 0.0)
    scale_g = params["wg_bn_gamma"] / jnp.sqrt(var_g + eps)
    shift_g = params["wg_bn_beta"] - mean_g * scale_g
    scale_x = params["wx_bn_gamma"] / jnp.sqrt(var_x + eps)
    shift_x = params["wx_bn_beta"] - mean_x * scale_x

    # ---- pass 2: gate logits p + their batch statistics --------------------
    wpsi_vec = params["psi_w"].reshape(f_int).astype(jnp.float32)
    bpsi = params["psi_b"].astype(jnp.float32)[0]
    aff = jnp.stack(
        [bg, bx, scale_g, shift_g, scale_x, shift_x, wpsi_vec,
         jnp.full((f_int,), bpsi, jnp.float32)], axis=1)          # (f_int, 8)

    p, pstats = pl.pallas_call(
        functools.partial(_gate_logit_kernel, m_true=m, tm=tm),
        out_shape=(jax.ShapeDtypeStruct((1, mp), jnp.float32),
                   jax.ShapeDtypeStruct((ntiles, 1, 8), jnp.float32)),
        grid=(ntiles,),
        in_specs=[
            pl.BlockSpec((f_l, tm), lambda i: (0, i)),
            pl.BlockSpec((f_g, tm), lambda i: (0, i)),
            pl.BlockSpec((f_int, f_l), lambda i: (0, 0)),
            pl.BlockSpec((f_int, f_g), lambda i: (0, 0)),
            pl.BlockSpec((f_int, 8), lambda i: (0, 0)),
        ],
        out_specs=(pl.BlockSpec((1, tm), lambda i: (0, i)),
                   pl.BlockSpec((1, 1, 8), lambda i: (i, 0, 0))),
        compiler_params=parallel,
    )(g_cm, x_cm, wg, wx, aff)

    pst = jnp.sum(pstats, axis=0)                     # (1, 8)
    mean_p = pst[0, 0] / m
    var_p = jnp.maximum(pst[0, 1] / m - mean_p * mean_p, 0.0)
    scale_p = params["psi_bn_gamma"][0] / jnp.sqrt(var_p + eps)
    shift_p = params["psi_bn_beta"][0] - mean_p * scale_p
    sc3 = jnp.concatenate(
        [jnp.stack([scale_p, shift_p]).reshape(1, 2),
         jnp.zeros((1, 6), jnp.float32)], axis=1)     # (1, 8)

    # ---- pass 3: out = x * sigmoid(BN(p)) -----------------------------------
    out_cm = pl.pallas_call(
        _apply_gate_kernel,
        out_shape=jax.ShapeDtypeStruct((f_g, mp), jnp.float32),
        grid=(ntiles,),
        in_specs=[
            pl.BlockSpec((f_g, tm), lambda i: (0, i)),
            pl.BlockSpec((1, tm), lambda i: (0, i)),
            pl.BlockSpec((1, 8), lambda i: (0, 0)),
        ],
        out_specs=pl.BlockSpec((f_g, tm), lambda i: (0, i)),
        compiler_params=parallel,
    )(x_cm, p, sc3)

    out = out_cm[:, :m].reshape(f_g, n, h, w)
    return jnp.transpose(out, (1, 0, 2, 3))           # back to NCHW


# ----------------------------------------------------------------------------
# Parameters (mirror the PyTorch module; BN defaults gamma=1, beta=0)
# ----------------------------------------------------------------------------
def init_attention_block_params(key, f_g, f_l, f_int):
    def conv(k, cin, cout):
        kw, kb = jax.random.split(k)
        bound = 1.0 / math.sqrt(cin)
        return (jax.random.uniform(kw, (cout, cin, 1, 1), jnp.float32, -bound, bound),
                jax.random.uniform(kb, (cout,), jnp.float32, -bound, bound))

    k0, k1, k2 = jax.random.split(key, 3)
    wg_w, wg_b = conv(k0, f_l, f_int)     # W_g: Conv2d(F_l, F_int, 1)
    wx_w, wx_b = conv(k1, f_g, f_int)     # W_x: Conv2d(F_g, F_int, 1)
    psi_w, psi_b = conv(k2, f_int, 1)     # psi: Conv2d(F_int, 1, 1)
    return {
        "wg_w": wg_w, "wg_b": wg_b,
        "wg_bn_gamma": jnp.ones((f_int,), jnp.float32),
        "wg_bn_beta": jnp.zeros((f_int,), jnp.float32),
        "wx_w": wx_w, "wx_b": wx_b,
        "wx_bn_gamma": jnp.ones((f_int,), jnp.float32),
        "wx_bn_beta": jnp.zeros((f_int,), jnp.float32),
        "psi_w": psi_w, "psi_b": psi_b,
        "psi_bn_gamma": jnp.ones((1,), jnp.float32),
        "psi_bn_beta": jnp.zeros((1,), jnp.float32),
    }


# ----------------------------------------------------------------------------
# Pure-JAX reference (training-mode BatchNorm, matches the PyTorch forward)
# ----------------------------------------------------------------------------
def attention_block_reference(params, g, x, eps=1e-5):
    def conv1x1(t, w_, b_):
        return jnp.einsum("nchw,oc->nohw", t, w_[:, :, 0, 0]) + b_[None, :, None, None]

    def bn(t, gamma, beta):
        mean = jnp.mean(t, axis=(0, 2, 3), keepdims=True)
        var = jnp.var(t, axis=(0, 2, 3), keepdims=True)
        return ((t - mean) / jnp.sqrt(var + eps) * gamma[None, :, None, None]
                + beta[None, :, None, None])

    g1 = bn(conv1x1(g, params["wg_w"], params["wg_b"]),
            params["wg_bn_gamma"], params["wg_bn_beta"])
    x1 = bn(conv1x1(x, params["wx_w"], params["wx_b"]),
            params["wx_bn_gamma"], params["wx_bn_beta"])
    s = jnp.maximum(g1 + x1, 0.0)
    p = bn(conv1x1(s, params["psi_w"], params["psi_b"]),
           params["psi_bn_gamma"], params["psi_bn_beta"])
    return x * jax.nn.sigmoid(p)


# ----------------------------------------------------------------------------
if __name__ == "__main__":
    key = jax.random.PRNGKey(0)
    kg, kx, kp = jax.random.split(key, 3)

    # Attention_block(F_g=32, F_l=32, F_int=16); g: F_l channels, x: F_g channels
    F_g, F_l, F_int = 32, 32, 16
    N, H, W = 2, 16, 16
    g = jax.random.normal(kg, (N, F_l, H, W), dtype=jnp.float32)
    x = jax.random.normal(kx, (N, F_g, H, W), dtype=jnp.float32)
    params = init_attention_block_params(kp, F_g, F_l, F_int)

    fwd = jax.jit(attention_block_forward)
    out = jax.block_until_ready(fwd(params, g, x))

    assert out.shape == (N, F_g, H, W), out.shape
    assert out.dtype == jnp.float32
    assert bool(jnp.all(jnp.isfinite(out)))

    ref = attention_block_reference(params, g, x)
    assert bool(jnp.allclose(out, ref, atol=5e-2, rtol=5e-2)), \
        float(jnp.max(jnp.abs(out - ref)))
    print("KERNEL_OK")
</pallas_src>

<mosaic_0001>
module attributes {stable_mosaic.version = 11 : i64} {
  func.func @_gx_stats_kernel(%arg0: i32, %arg1: memref<32x512xf32, #tpu.memory_space<vmem>>, %arg2: memref<32x512xf32, #tpu.memory_space<vmem>>, %arg3: memref<16x32xbf16, #tpu.memory_space<vmem>>, %arg4: memref<16x32xbf16, #tpu.memory_space<vmem>>, %arg5: memref<16x8xf32, #tpu.memory_space<vmem>>, %arg6: memref<1x16x8xf32, #tpu.memory_space<vmem>>) attributes {dimension_semantics = [#tpu.dimension_semantics<parallel>], iteration_bounds = array<i64: 1>, scalar_prefetch = 0 : i64, scratch_operands = 0 : i64, tpu.core_type = #tpu.core_type<tc>, window_params = [{transform_indices = @transform_0, window_bounds = array<i64: 32, 512>}, {transform_indices = @transform_1, window_bounds = array<i64: 32, 512>}, {pipeline_mode = #tpu.pipeline_mode<synchronous>, transform_indices = @transform_2, window_bounds = array<i64: 16, 32>}, {pipeline_mode = #tpu.pipeline_mode<synchronous>, transform_indices = @transform_3, window_bounds = array<i64: 16, 32>}, {pipeline_mode = #tpu.pipeline_mode<synchronous>, transform_indices = @transform_4, window_bounds = array<i64: 16, 8>}, {transform_indices = @transform_5, window_bounds = array<i64: 1, 16, 8>}]} {
    %0 = tpu.iota {dimensions = array<i32: 1>} : vector<1x512xi32>
    %c512_i32 = arith.constant 512 : i32
    %1 = arith.muli %arg0, %c512_i32 : i32
    %2 = vector.broadcast %1 : i32 to vector<1x512xi32>
    %3 = arith.addi %0, %2 : vector<1x512xi32>
    %c512_i32_0 = arith.constant 512 : i32
    %4 = vector.broadcast %c512_i32_0 : i32 to vector<1x512xi32>
    %5 = arith.cmpi slt, %3, %4 : vector<1x512xi32>
    %c0 = arith.constant 0 : index
    %c0_1 = arith.constant 0 : index
    %6 = vector.load %arg3[%c0, %c0_1] : memref<16x32xbf16, #tpu.memory_space<vmem>>, vector<16x32xbf16>
    %c0_2 = arith.constant 0 : index
    %c0_3 = arith.constant 0 : index
    %7 = vector.load %arg1[%c0_2, %c0_3] : memref<32x512xf32, #tpu.memory_space<vmem>>, vector<32x512xf32>
    %8 = arith.truncf %7 : vector<32x512xf32> to vector<32x512xbf16>
    %cst = arith.constant dense<0.000000e+00> : vector<16x512xf32>
    %9 = tpu.matmul %6, %8, %cst {dimension_numbers = #tpu.dot_dimension_numbers<[1], [0], [0], [1], [0, 0, 1, 1], [], []>} : vector<16x32xbf16>, vector<32x512xbf16>, vector<16x512xf32> -> vector<16x512xf32>
    %c0_4 = arith.constant 0 : index
    %c0_5 = arith.constant 0 : index
    %10 = vector.load %arg5[%c0_4, %c0_5] : memref<16x8xf32, #tpu.memory_space<vmem>>, vector<16x1xf32>
    %11 = vector.broadcast %10 : vector<16x1xf32> to vector<16x512xf32>
    %12 = arith.addf %9, %11 : vector<16x512xf32>
    %c0_6 = arith.constant 0 : index
    %c0_7 = arith.constant 0 : index
    %13 = vector.load %arg4[%c0_6, %c0_7] : memref<16x32xbf16, #tpu.memory_space<vmem>>, vector<16x32xbf16>
    %c0_8 = arith.constant 0 : index
    %c0_9 = arith.constant 0 : index
    %14 = vector.load %arg2[%c0_8, %c0_9] : memref<32x512xf32, #tpu.memory_space<vmem>>, vector<32x512xf32>
    %15 = arith.truncf %14 : vector<32x512xf32> to vector<32x512xbf16>
    %cst_10 = arith.constant dense<0.000000e+00> : vector<16x512xf32>
    %16 = tpu.matmul %13, %15, %cst_10 {dimension_numbers = #tpu.dot_dimension_numbers<[1], [0], [0], [1], [0, 0, 1, 1], [], []>} : vector<16x32xbf16>, vector<32x512xbf16>, vector<16x512xf32> -> vector<16x512xf32>
    %c0_11 = arith.constant 0 : index
    %c1 = arith.constant 1 : index
    %17 = vector.load %arg5[%c0_11, %c1] : memref<16x8xf32, #tpu.memory_space<vmem>>, vector<16x1xf32>
    %18 = vector.broadcast %17 : vector<16x1xf32> to vector<16x512xf32>
    %19 = arith.addf %16, %18 : vector<16x512xf32>
    %cst_12 = arith.constant 0.000000e+00 : f32
    %20 = vector.shape_cast %5 : vector<1x512xi1> to vector<1x512xi1>
    %21 = vector.broadcast %20 : vector<1x512xi1> to vector<16x512xi1>
    %22 = vector.broadcast %cst_12 : f32 to vector<16x512xf32>
    %23 = arith.select %21, %12, %22 : vector<16x512xi1>, vector<16x512xf32>
    %cst_13 = arith.constant 0.000000e+00 : f32
    %24 = vector.shape_cast %5 : vector<1x512xi1> to vector<1x512xi1>
    %25 = vector.broadcast %24 : vector<1x512xi1> to vector<16x512xi1>
    %26 = vector.broadcast %cst_13 : f32 to vector<16x512xf32>
    %27 = arith.select %25, %19, %26 : vector<16x512xi1>, vector<16x512xf32>
    %cst_14 = arith.constant dense<0.000000e+00> : vector<16xf32>
    %28 = vector.multi_reduction <add>, %23, %cst_14 [1] : vector<16x512xf32> to vector<16xf32>
    %29 = vector.shape_cast %28 : vector<16xf32> to vector<16x1xf32>
    %30 = arith.mulf %23, %23 : vector<16x512xf32>
    %cst_15 = arith.constant dense<0.000000e+00> : vector<16xf32>
    %31 = vector.multi_reduction <add>, %30, %cst_15 [1] : vector<16x512xf32> to vector<16xf32>
    %32 = vector.shape_cast %31 : vector<16xf32> to vector<16x1xf32>
    %cst_16 = arith.constant dense<0.000000e+00> : vector<16xf32>
    %33 = vector.multi_reduction <add>, %27, %cst_16 [1] : vector<16x512xf32> to vector<16xf32>
    %34 = vector.shape_cast %33 : vector<16xf32> to vector<16x1xf32>
    %35 = arith.mulf %27, %27 : vector<16x512xf32>
    %cst_17 = arith.constant dense<0.000000e+00> : vector<16xf32>
    %36 = vector.multi_reduction <add>, %35, %cst_17 [1] : vector<16x512xf32> to vector<16xf32>
    %37 = vector.shape_cast %36 : vector<16xf32> to vector<16x1xf32>
    %cst_18 = arith.constant 0.000000e+00 : f32
    %38 = vector.broadcast %cst_18 : f32 to vector<16x4xf32>
    %39 = tpu.concatenate %29, %32, %34, %37, %38 in 1 : vector<16x1xf32>, vector<16x1xf32>, vector<16x1xf32>, vector<16x1xf32>, vector<16x4xf32> -> vector<16x8xf32>
    %c0_19 = arith.constant 0 : index
    %c0_20 = arith.constant 0 : index
    %c0_21 = arith.constant 0 : index
    %40 = vector.load %arg6[%c0_19, %c0_20, %c0_21] : memref<1x16x8xf32, #tpu.memory_space<vmem>>, vector<1x16x8xf32>
    %41 = vector.shape_cast %40 : vector<1x16x8xf32> to vector<16x8xf32>
    %42 = vector.shape_cast %39 : vector<16x8xf32> to vector<1x16x8xf32>
    tpu.vector_store %arg6[%c0_19, %c0_20, %c0_21], %42 {strides = array<i32>} : memref<1x16x8xf32, #tpu.memory_space<vmem>>, vector<1x16x8xf32>,
    return
  }
  func.func @transform_0(%arg0: i32) -> (i32, i32) {
    %c0_i32 = arith.constant 0 : i32
    %c0_i32_0 = arith.constant 0 : i32
    return %c0_i32, %arg0 : i32, i32
  }
  func.func @transform_1(%arg0: i32) -> (i32, i32) {
    %c0_i32 = arith.constant 0 : i32
    %c0_i32_0 = arith.constant 0 : i32
    return %c0_i32, %arg0 : i32, i32
  }
  func.func @transform_2(%arg0: i32) -> (i32, i32) {
    %c0_i32 = arith.constant 0 : i32
    %c0_i32_0 = arith.constant 0 : i32
    %c0_i32_1 = arith.constant 0 : i32
    return %c0_i32, %c0_i32_0 : i32, i32
  }
  func.func @transform_3(%arg0: i32) -> (i32, i32) {
    %c0_i32 = arith.constant 0 : i32
    %c0_i32_0 = arith.constant 0 : i32
    %c0_i32_1 = arith.constant 0 : i32
    return %c0_i32, %c0_i32_0 : i32, i32
  }
  func.func @transform_4(%arg0: i32) -> (i32, i32) {
    %c0_i32 = arith.constant 0 : i32
    %c0_i32_0 = arith.constant 0 : i32
    %c0_i32_1 = arith.constant 0 : i32
    return %c0_i32, %c0_i32_0 : i32, i32
  }
  func.func @transform_5(%arg0: i32) -> (i32, i32, i32) {
    %c0_i32 = arith.constant 0 : i32
    %c0_i32_0 = arith.constant 0 : i32
    %c0_i32_1 = arith.constant 0 : i32
    return %arg0, %c0_i32, %c0_i32_0 : i32, i32, i32
  }
}

module attributes {stable_mosaic.version = 11 : i64} {
  func.func @_gate_logit_kernel(%arg0: i32, %arg1: memref<32x512xf32, #tpu.memory_space<vmem>>, %arg2: memref<32x512xf32, #tpu.memory_space<vmem>>, %arg3: memref<16x32xbf16, #tpu.memory_space<vmem>>, %arg4: memref<16x32xbf16, #tpu.memory_space<vmem>>, %arg5: memref<16x8xf32, #tpu.memory_space<vmem>>, %arg6: memref<1x512xf32, #tpu.memory_space<vmem>>, %arg7: memref<1x1x8xf32, #tpu.memory_space<vmem>>) attributes {dimension_semantics = [#tpu.dimension_semantics<parallel>], iteration_bounds = array<i64: 1>, scalar_prefetch = 0 : i64, scratch_operands = 0 : i64, tpu.core_type = #tpu.core_type<tc>, window_params = [{transform_indices = @transform_0, window_bounds = array<i64: 32, 512>}, {transform_indices = @transform_1, window_bounds = array<i64: 32, 512>}, {pipeline_mode = #tpu.pipeline_mode<synchronous>, transform_indices = @transform_2, window_bounds = array<i64: 16, 32>}, {pipeline_mode = #tpu.pipeline_mode<synchronous>, transform_indices = @transform_3, window_bounds = array<i64: 16, 32>}, {pipeline_mode = #tpu.pipeline_mode<synchronous>, transform_indices = @transform_4, window_bounds = array<i64: 16, 8>}, {transform_indices = @transform_5, window_bounds = array<i64: 1, 512>}, {transform_indices = @transform_6, window_bounds = array<i64: 1, 1, 8>}]} {
    %0 = tpu.iota {dimensions = array<i32: 1>} : vector<1x512xi32>
    %c512_i32 = arith.constant 512 : i32
    %1 = arith.muli %arg0, %c512_i32 : i32
    %2 = vector.broadcast %1 : i32 to vector<1x512xi32>
    %3 = arith.addi %0, %2 : vector<1x512xi32>
    %c512_i32_0 = arith.constant 512 : i32
    %4 = vector.broadcast %c512_i32_0 : i32 to vector<1x512xi32>
    %5 = arith.cmpi slt, %3, %4 : vector<1x512xi32>
    %c0 = arith.constant 0 : index
    %c0_1 = arith.constant 0 : index
    %6 = vector.load %arg3[%c0, %c0_1] : memref<16x32xbf16, #tpu.memory_space<vmem>>, vector<16x32xbf16>
    %c0_2 = arith.constant 0 : index
    %c0_3 = arith.constant 0 : index
    %7 = vector.load %arg1[%c0_2, %c0_3] : memref<32x512xf32, #tpu.memory_space<vmem>>, vector<32x512xf32>
    %8 = arith.truncf %7 : vector<32x512xf32> to vector<32x512xbf16>
    %cst = arith.constant dense<0.000000e+00> : vector<16x512xf32>
    %9 = tpu.matmul %6, %8, %cst {dimension_numbers = #tpu.dot_dimension_numbers<[1], [0], [0], [1], [0, 0, 1, 1], [], []>} : vector<16x32xbf16>, vector<32x512xbf16>, vector<16x512xf32> -> vector<16x512xf32>
    %c0_4 = arith.constant 0 : index
    %c0_5 = arith.constant 0 : index
    %10 = vector.load %arg5[%c0_4, %c0_5] : memref<16x8xf32, #tpu.memory_space<vmem>>, vector<16x1xf32>
    %11 = vector.broadcast %10 : vector<16x1xf32> to vector<16x512xf32>
    %12 = arith.addf %9, %11 : vector<16x512xf32>
    %c0_6 = arith.constant 0 : index
    %c0_7 = arith.constant 0 : index
    %13 = vector.load %arg4[%c0_6, %c0_7] : memref<16x32xbf16, #tpu.memory_space<vmem>>, vector<16x32xbf16>
    %c0_8 = arith.constant 0 : index
    %c0_9 = arith.constant 0 : index
    %14 = vector.load %arg2[%c0_8, %c0_9] : memref<32x512xf32, #tpu.memory_space<vmem>>, vector<32x512xf32>
    %15 = arith.truncf %14 : vector<32x512xf32> to vector<32x512xbf16>
    %cst_10 = arith.constant dense<0.000000e+00> : vector<16x512xf32>
    %16 = tpu.matmul %13, %15, %cst_10 {dimension_numbers = #tpu.dot_dimension_numbers<[1], [0], [0], [1], [0, 0, 1, 1], [], []>} : vector<16x32xbf16>, vector<32x512xbf16>, vector<16x512xf32> -> vector<16x512xf32>
    %c0_11 = arith.constant 0 : index
    %c1 = arith.constant 1 : index
    %17 = vector.load %arg5[%c0_11, %c1] : memref<16x8xf32, #tpu.memory_space<vmem>>, vector<16x1xf32>
    %18 = vector.broadcast %17 : vector<16x1xf32> to vector<16x512xf32>
    %19 = arith.addf %16, %18 : vector<16x512xf32>
    %c0_12 = arith.constant 0 : index
    %c2 = arith.constant 2 : index
    %20 = vector.load %arg5[%c0_12, %c2] : memref<16x8xf32, #tpu.memory_space<vmem>>, vector<16x1xf32>
    %21 = vector.broadcast %20 : vector<16x1xf32> to vector<16x512xf32>
    %22 = arith.mulf %12, %21 : vector<16x512xf32>
    %c0_13 = arith.constant 0 : index
    %c3 = arith.constant 3 : index
    %23 = vector.load %arg5[%c0_13, %c3] : memref<16x8xf32, #tpu.memory_space<vmem>>, vector<16x1xf32>
    %24 = vector.broadcast %23 : vector<16x1xf32> to vector<16x512xf32>
    %25 = arith.addf %22, %24 : vector<16x512xf32>
    %c0_14 = arith.constant 0 : index
    %c4 = arith.constant 4 : index
    %26 = vector.load %arg5[%c0_14, %c4] : memref<16x8xf32, #tpu.memory_space<vmem>>, vector<16x1xf32>
    %27 = vector.broadcast %26 : vector<16x1xf32> to vector<16x512xf32>
    %28 = arith.mulf %19, %27 : vector<16x512xf32>
    %c0_15 = arith.constant 0 : index
    %c5 = arith.constant 5 : index
    %29 = vector.load %arg5[%c0_15, %c5] : memref<16x8xf32, #tpu.memory_space<vmem>>, vector<16x1xf32>
    %30 = vector.broadcast %29 : vector<16x1xf32> to vector<16x512xf32>
    %31 = arith.addf %28, %30 : vector<16x512xf32>
    %32 = arith.addf %25, %31 : vector<16x512xf32>
    %cst_16 = arith.constant 0.000000e+00 : f32
    %33 = vector.broadcast %cst_16 : f32 to vector<16x512xf32>
    %34 = arith.maximumf %32, %33 : vector<16x512xf32>
    %c0_17 = arith.constant 0 : index
    %c6 = arith.constant 6 : index
    %35 = vector.load %arg5[%c0_17, %c6] : memref<16x8xf32, #tpu.memory_space<vmem>>, vector<16x1xf32>
    %36 = vector.broadcast %35 : vector<16x1xf32> to vector<16x512xf32>
    %37 = arith.mulf %34, %36 : vector<16x512xf32>
    %cst_18 = arith.constant dense<0.000000e+00> : vector<512xf32>
    %38 = vector.multi_reduction <add>, %37, %cst_18 [0] : vector<16x512xf32> to vector<512xf32>
    %39 = vector.shape_cast %38 : vector<512xf32> to vector<1x512xf32>
    %c0_19 = arith.constant 0 : index
    %c7 = arith.constant 7 : index
    %40 = vector.load %arg5[%c0_19, %c7] : memref<16x8xf32, #tpu.memory_space<vmem>>, vector<1x1xf32>
    %41 = vector.broadcast %40 : vector<1x1xf32> to vector<1x512xf32>
    %42 = arith.addf %39, %41 : vector<1x512xf32>
    %c0_20 = arith.constant 0 : index
    %c0_21 = arith.constant 0 : index
    %43 = vector.load %arg6[%c0_20, %c0_21] : memref<1x512xf32, #tpu.memory_space<vmem>>, vector<1x512xf32>
    tpu.vector_store %arg6[%c0_20, %c0_21], %42 {strides = array<i32>} : memref<1x512xf32, #tpu.memory_space<vmem>>, vector<1x512xf32>,
    %cst_22 = arith.constant 0.000000e+00 : f32
    %44 = vector.broadcast %cst_22 : f32 to vector<1x512xf32>
    %45 = arith.select %5, %42, %44 : vector<1x512xi1>, vector<1x512xf32>
    %cst_23 = arith.constant dense<0.000000e+00> : vector<1xf32>
    %46 = vector.multi_reduction <add>, %45, %cst_23 [1] : vector<1x512xf32> to vector<1xf32>
    %47 = vector.shape_cast %46 : vector<1xf32> to vector<1x1xf32>
    %48 = arith.mulf %45, %45 : vector<1x512xf32>
    %cst_24 = arith.constant dense<0.000000e+00> : vector<1xf32>
    %49 = vector.multi_reduction <add>, %48, %cst_24 [1] : vector<1x512xf32> to vector<1xf32>
    %50 = vector.shape_cast %49 : vector<1xf32> to vector<1x1xf32>
    %cst_25 = arith.constant 0.000000e+00 : f32
    %51 = vector.broadcast %cst_25 : f32 to vector<1x6xf32>
    %52 = tpu.concatenate %47, %50, %51 in 1 : vector<1x1xf32>, vector<1x1xf32>, vector<1x6xf32> -> vector<1x8xf32>
    %c0_26 = arith.constant 0 : index
    %c0_27 = arith.constant 0 : index
    %c0_28 = arith.constant 0 : index
    %53 = vector.load %arg7[%c0_26, %c0_27, %c0_28] : memref<1x1x8xf32, #tpu.memory_space<vmem>>, vector<1x1x8xf32>
    %54 = vector.shape_cast %53 : vector<1x1x8xf32> to vector<1x8xf32>
    %55 = vector.shape_cast %52 : vector<1x8xf32> to vector<1x1x8xf32>
    tpu.vector_store %arg7[%c0_26, %c0_27, %c0_28], %55 {strides = array<i32>} : memref<1x1x8xf32, #tpu.memory_space<vmem>>, vector<1x1x8xf32>,
    return
  }
  func.func @transform_0(%arg0: i32) -> (i32, i32) {
    %c0_i32 = arith.constant 0 : i32
    %c0_i32_0 = arith.constant 0 : i32
    return %c0_i32, %arg0 : i32, i32
  }
  func.func @transform_1(%arg0: i32) -> (i32, i32) {
    %c0_i32 = arith.constant 0 : i32
    %c0_i32_0 = arith.constant 0 : i32
    return %c0_i32, %arg0 : i32, i32
  }
  func.func @transform_2(%arg0: i32) -> (i32, i32) {
    %c0_i32 = arith.constant 0 : i32
    %c0_i32_0 = arith.constant 0 : i32
    %c0_i32_1 = arith.constant 0 : i32
    return %c0_i32, %c0_i32_0 : i32, i32
  }
  func.func @transform_3(%arg0: i32) -> (i32, i32) {
    %c0_i32 = arith.constant 0 : i32
    %c0_i32_0 = arith.constant 0 : i32
    %c0_i32_1 = arith.constant 0 : i32
    return %c0_i32, %c0_i32_0 : i32, i32
  }
  func.func @transform_4(%arg0: i32) -> (i32, i32) {
    %c0_i32 = arith.constant 0 : i32
    %c0_i32_0 = arith.constant 0 : i32
    %c0_i32_1 = arith.constant 0 : i32
    return %c0_i32, %c0_i32_0 : i32, i32
  }
  func.func @transform_5(%arg0: i32) -> (i32, i32) {
    %c0_i32 = arith.constant 0 : i32
    %c0_i32_0 = arith.constant 0 : i32
    return %c0_i32, %arg0 : i32, i32
  }
  func.func @transform_6(%arg0: i32) -> (i32, i32, i32) {
    %c0_i32 = arith.constant 0 : i32
    %c0_i32_0 = arith.constant 0 : i32
    %c0_i32_1 = arith.constant 0 : i32
    return %arg0, %c0_i32, %c0_i32_0 : i32, i32, i32
  }
}

module attributes {stable_mosaic.version = 11 : i64} {
  func.func @_apply_gate_kernel(%arg0: i32, %arg1: memref<32x512xf32, #tpu.memory_space<vmem>>, %arg2: memref<1x512xf32, #tpu.memory_space<vmem>>, %arg3: memref<1x8xf32, #tpu.memory_space<vmem>>, %arg4: memref<32x512xf32, #tpu.memory_space<vmem>>) attributes {dimension_semantics = [#tpu.dimension_semantics<parallel>], iteration_bounds = array<i64: 1>, scalar_prefetch = 0 : i64, scratch_operands = 0 : i64, tpu.core_type = #tpu.core_type<tc>, window_params = [{transform_indices = @transform_0, window_bounds = array<i64: 32, 512>}, {transform_indices = @transform_1, window_bounds = array<i64: 1, 512>}, {pipeline_mode = #tpu.pipeline_mode<synchronous>, transform_indices = @transform_2, window_bounds = array<i64: 1, 8>}, {transform_indices = @transform_3, window_bounds = array<i64: 32, 512>}]} {
    %c0 = arith.constant 0 : index
    %c0_0 = arith.constant 0 : index
    %0 = vector.load %arg2[%c0, %c0_0] : memref<1x512xf32, #tpu.memory_space<vmem>>, vector<1x512xf32>
    %c0_1 = arith.constant 0 : index
    %c0_2 = arith.constant 0 : index
    %1 = vector.load %arg3[%c0_1, %c0_2] : memref<1x8xf32, #tpu.memory_space<vmem>>, vector<1x1xf32>
    %2 = vector.broadcast %1 : vector<1x1xf32> to vector<1x512xf32>
    %3 = arith.mulf %0, %2 : vector<1x512xf32>
    %c0_3 = arith.constant 0 : index
    %c1 = arith.constant 1 : index
    %4 = vector.load %arg3[%c0_3, %c1] : memref<1x8xf32, #tpu.memory_space<vmem>>, vector<1x1xf32>
    %5 = vector.broadcast %4 : vector<1x1xf32> to vector<1x512xf32>
    %6 = arith.addf %3, %5 : vector<1x512xf32>
    %7 = arith.negf %6 : vector<1x512xf32>
    %8 = math.exp %7 : vector<1x512xf32>
    %cst = arith.constant 1.000000e+00 : f32
    %9 = vector.broadcast %cst : f32 to vector<1x512xf32>
    %10 = arith.addf %9, %8 : vector<1x512xf32>
    %11 = arith.divf %9, %10 : vector<1x512xf32>
    %c0_4 = arith.constant 0 : index
    %c0_5 = arith.constant 0 : index
    %12 = vector.load %arg1[%c0_4, %c0_5] : memref<32x512xf32, #tpu.memory_space<vmem>>, vector<32x512xf32>
    %13 = vector.broadcast %11 : vector<1x512xf32> to vector<32x512xf32>
    %14 = arith.mulf %12, %13 : vector<32x512xf32>
    %c0_6 = arith.constant 0 : index
    %c0_7 = arith.constant 0 : index
    %15 = vector.load %arg4[%c0_6, %c0_7] : memref<32x512xf32, #tpu.memory_space<vmem>>, vector<32x512xf32>
    tpu.vector_store %arg4[%c0_6, %c0_7], %14 {strides = array<i32>} : memref<32x512xf32, #tpu.memory_space<vmem>>, vector<32x512xf32>,
    return
  }
  func.func @transform_0(%arg0: i32) -> (i32, i32) {
    %c0_i32 = arith.constant 0 : i32
    %c0_i32_0 = arith.constant 0 : i32
    return %c0_i32, %arg0 : i32, i32
  }
  func.func @transform_1(%arg0: i32) -> (i32, i32) {
    %c0_i32 = arith.constant 0 : i32
    %c0_i32_0 = arith.constant 0 : i32
    return %c0_i32, %arg0 : i32, i32
  }
  func.func @transform_2(%arg0: i32) -> (i32, i32) {
    %c0_i32 = arith.constant 0 : i32
    %c0_i32_0 = arith.constant 0 : i32
    %c0_i32_1 = arith.constant 0 : i32
    return %c0_i32, %c0_i32_0 : i32, i32
  }
  func.func @transform_3(%arg0: i32) -> (i32, i32) {
    %c0_i32 = arith.constant 0 : i32
    %c0_i32_0 = arith.constant 0 : i32
    return %c0_i32, %arg0 : i32, i32
  }
}

</mosaic_0001>

<bundles_post_ra>
// kernel: attention_block_forward.5
= control target key start
LH: loop header
LB: loop body
LE: loop exit
PB: predicated region body
PF: predicated region fallthrough
CT: control target
= control target key end

     0   :  { %v123_v0 = vmov 0   ;;  %v124_v2 = vmov 1   ;;  %v21_v3 = vlaneseq  ;;  %s247_s2 = inlined_call_operand.vmem [shape: f32[1,8], index: 2, kind: input, shape index: {}]   ;;  %s248_s1 = inlined_call_operand.vmem [shape: f32[1,512], index: 1, kind: input, shape index: {}]   ;;  %s249_s0 = inlined_call_operand.vmem [shape: f32[32,512], index: 0, kind: input, shape index: {}]   ;;  %s250_s3 = inlined_call_operand.vmem [shape: f32[32,512], index: 3, kind: output, shape index: {}]  }
   0x1   :  { %117 = vset.pattern.permute.xlu0 %v123_v0  ;;  %v15_v1 = vld [vmem:[%s247_s2] sm:$0x1]  ;;  %v42_v20 = vld [vmem:[%s249_s0 + $0x8] sm:$0xff]  ;;  %v43_v21 = vld [vmem:[%s249_s0 + $0x10] sm:$0xff] }
   0x2   :  { %18 = vperm.xlu0 %117, %v15_v1   ;;  %v22_v4 = vshrl.u32 %v21_v3, 7  ;;  %v14_v8 = vld [vmem:[%s248_s1] sm:$0xf]  ;;  %v44_v22 = vld [vmem:[%s249_s0 + $0x18] sm:$0xff]  ;;  %v46_v25 = vld [vmem:[%s249_s0 + $0x28] sm:$0xff] }
   0x3   :  { %v41_v19 = vld [vmem:[%s249_s0] sm:$0xff]  ;;  %v47_v26 = vld [vmem:[%s249_s0 + $0x30] sm:$0xff]  ;;  %v48_v27 = vld [vmem:[%s249_s0 + $0x38] sm:$0xff] }
   0x4   :  { %v23_v5 = vsub.s32 0, %v22_v4  ;;  %v64_v16 = vsub.s32 1, %v22_v4  ;;  %v68_v17 = vsub.s32 2, %v22_v4  ;;  %v72_v18 = vsub.s32 3, %v22_v4  ;;  %v45_v24 = vld [vmem:[%s249_s0 + $0x20] sm:$0xff]  ;;  %v50_v29 = vld [vmem:[%s249_s0 + $0x48] sm:$0xff] }
   0x5   :  { %v49_v28 = vld [vmem:[%s249_s0 + $0x40] sm:$0xff]  ;;  %v51_v34 = vld [vmem:[%s249_s0 + $0x50] sm:$0xff]  ;;  %v52_v35 = vld [vmem:[%s249_s0 + $0x58] sm:$0xff] }
   0x6   :  { %118 = vset.pattern.permute.xlu0 %v124_v2  ;;  %v53_v36 = vld [vmem:[%s249_s0 + $0x60] sm:$0xff]  ;;  %v54_v37 = vld [vmem:[%s249_s0 + $0x68] sm:$0xff]  ;;  %v55_v38 = vld [vmem:[%s249_s0 + $0x70] sm:$0xff] }
   0x7   :  { %27 = vperm.xlu0 %118, %v15_v1   ;;  %v56_v39 = vld [vmem:[%s249_s0 + $0x78] sm:$0xff] }
  0x7d   :  { %v19_v6 = vpop.permute.xlu0 %18 }
  0x7e   :  { %v24_v7 = vrot.slane %v19_v6, %v23_v5 }
  0x80   :  { %v25_v10 = vmul.f32 %v24_v7, %v14_v8 }
  0x82   :  { %v28_v9 = vpop.permute.xlu0 %27 }
  0x83   :  { %v33_v11 = vrot.slane %v28_v9, %v23_v5 }
  0x85   :  { %v34_v12 = vadd.f32 %v33_v11, %v25_v10 }
  0x87   :  { %v114_v13 = vmul.f32 -1.442695, %v34_v12 }
  0x89   :  { %119 = vpow2.f32 %v114_v13 }
  0x96   :  { %v120_v14 = vpop.eup %119 }
  0x97   :  { %v38_v15 = vadd.f32 1.0, %v120_v14 }
  0x99   :  { %121 = vrcp.f32 %v38_v15 }
  0xa6   :  { %v122_v23 = vpop.eup %121 }
  0xa7   :  { %v61_v30 = vrot.slane %v122_v23, %v23_v5  ;;  %v65_v31 = vrot.slane %v122_v23, %v64_v16  ;;  %v69_v32 = vrot.slane %v122_v23, %v68_v17  ;;  %v73_v33 = vrot.slane %v122_v23, %v72_v18 }
  0xa9   :  { %v78_v40 = vmul.f32 %v61_v30, %v41_v19  ;;  %v79_v41 = vmul.f32 %v65_v31, %v42_v20  ;;  %v80_v42 = vmul.f32 %v69_v32, %v43_v21  ;;  %v81_v43 = vmul.f32 %v73_v33, %v44_v22 }
  0xaa   :  { %v82_v44 = vmul.f32 %v61_v30, %v45_v24  ;;  %v83_v45 = vmul.f32 %v65_v31, %v46_v25  ;;  %v84_v46 = vmul.f32 %v69_v32, %v47_v26  ;;  %v85_v47 = vmul.f32 %v73_v33, %v48_v27 }
  0xab   :  { %v86_v48 = vmul.f32 %v61_v30, %v49_v28  ;;  %v87_v49 = vmul.f32 %v65_v31, %v50_v29  ;;  %v88_v50 = vmul.f32 %v69_v32, %v51_v34  ;;  %v89_v51 = vmul.f32 %v73_v33, %v52_v35  ;;  %94 = vst [vmem:[%s250_s3] sm:$0xff] %v78_v40 }
  0xac   :  { %95 = vst [vmem:[%s250_s3 + $0x8] sm:$0xff] %v79_v41  ;;  %96 = vst [vmem:[%s250_s3 + $0x10] sm:$0xff] %v80_v42  ;;  %v90_v52 = vmul.f32 %v61_v30, %v53_v36  ;;  %v91_v53 = vmul.f32 %v65_v31, %v54_v37  ;;  %v92_v54 = vmul.f32 %v69_v32, %v55_v38 }
  0xad   :  { %97 = vst [vmem:[%s250_s3 + $0x18] sm:$0xff] %v81_v43  ;;  %v93_v55 = vmul.f32 %v73_v33, %v56_v39  ;;  %98 = vst [vmem:[%s250_s3 + $0x20] sm:$0xff] %v82_v44 }
  0xae   :  { %99 = vst [vmem:[%s250_s3 + $0x28] sm:$0xff] %v83_v45  ;;  %100 = vst [vmem:[%s250_s3 + $0x30] sm:$0xff] %v84_v46 }
  0xaf   :  { %101 = vst [vmem:[%s250_s3 + $0x38] sm:$0xff] %v85_v47  ;;  %102 = vst [vmem:[%s250_s3 + $0x40] sm:$0xff] %v86_v48 }
  0xb0   :  { %103 = vst [vmem:[%s250_s3 + $0x48] sm:$0xff] %v87_v49  ;;  %104 = vst [vmem:[%s250_s3 + $0x50] sm:$0xff] %v88_v50 }
  0xb1   :  { %105 = vst [vmem:[%s250_s3 + $0x58] sm:$0xff] %v89_v51  ;;  %106 = vst [vmem:[%s250_s3 + $0x60] sm:$0xff] %v90_v52 }
  0xb2   :  { %107 = vst [vmem:[%s250_s3 + $0x68] sm:$0xff] %v91_v53  ;;  %108 = vst [vmem:[%s250_s3 + $0x70] sm:$0xff] %v92_v54 }
  0xb3   :  { %109 = vst [vmem:[%s250_s3 + $0x78] sm:$0xff] %v93_v55 }

// kernel: attention_block_forward.3
= control target key start
LH: loop header
LB: loop body
LE: loop exit
PB: predicated region body
PF: predicated region fallthrough
CT: control target
= control target key end

     0   :  { %v409_v3 = vmov 0   ;;  %v410_v8 = vmov 1   ;;  %vm79_vm0 = vcmask 261120   ;;  %vm377_vm1 = vcmask 7168   ;;  %s566_s0 = inlined_call_operand.vmem [shape: f32[32,512], index: 0, kind: input, shape index: {}]   ;;  %s567_s2 = inlined_call_operand.vmem [shape: bf16[16,32], index: 2, kind: input, shape index: {}]   ;;  %s568_s1 = inlined_call_operand.vmem [shape: f32[32,512], index: 1, kind: input, shape index: {}]   ;;  %s569_s4 = inlined_call_operand.vmem [shape: f32[16,8], index: 4, kind: input, shape index: {}]   ;;  %s570_s3 = inlined_call_operand.vmem [shape: bf16[16,32], index: 3, kind: input, shape index: {}]   ;;  %s571_s5 = inlined_call_operand.vmem [shape: f32[1,16,8], index: 5, kind: output, shape index: {}]  }
   0x1   :  { %v47_v0 = vld [vmem:[%s566_s0 + $0x48] sm:$0xff]  ;;  %v49_v2 = vld [vmem:[%s566_s0 + $0x58] sm:$0xff]  ;;  %115 = vmatprep.mubr.bf16.mxu0 %v409_v3  ;;  %158 = vmatprep.mubr.bf16.mxu1 %v409_v3  ;;  %v46_v6 = vld [vmem:[%s566_s0 + $0x40] sm:$0xff]  ;;  %vm380_vm2 = vcmask 15360   ;;  %vm383_vm3 = vcmask 23552   ;;  %vm386_vm4 = vcmask 31744  }
   0x2   :  { %v51_v1 = vld [vmem:[%s566_s0 + $0x68] sm:$0xff]  ;;  %v53_v5 = vld [vmem:[%s566_s0 + $0x78] sm:$0xff]  ;;  %v50_v7 = vld [vmem:[%s566_s0 + $0x60] sm:$0xff]  ;;  %404 = vset.pattern.permute.xlu0 %v409_v3  ;;  %405 = vset.pattern.permute.xlu1 %v410_v8  ;;  %vm389_vm5 = vcmask 64512  }
   0x3   :  { %v59_v4 = vpack.c.bf16 %v51_v1, %v47_v0  ;;  %v61_v9 = vpack.c.bf16 %v53_v5, %v49_v2  ;;  %v58_v10 = vpack.c.bf16 %v50_v7, %v46_v6  ;;  %v48_v11 = vld [vmem:[%s566_s0 + $0x50] sm:$0xff]  ;;  %v39_v13 = vld [vmem:[%s566_s0 + $0x8] sm:$0xff]  ;;  %v41_v16 = vld [vmem:[%s566_s0 + $0x18] sm:$0xff] }
   0x4   :  { %v52_v12 = vld [vmem:[%s566_s0 + $0x70] sm:$0xff]  ;;  %v43_v15 = vld [vmem:[%s566_s0 + $0x28] sm:$0xff]  ;;  %v45_v17 = vld [vmem:[%s566_s0 + $0x38] sm:$0xff] }
   0x5   :  { %95 = vmatprep.subr.bf16.mxu0 %v59_v4  ;;  %v60_v14 = vpack.c.bf16 %v52_v12, %v48_v11  ;;  %138 = vmatprep.subr.bf16.mxu1 %v61_v9  ;;  %v55_v18 = vpack.c.bf16 %v43_v15, %v39_v13  ;;  %v57_v19 = vpack.c.bf16 %v45_v17, %v41_v16  ;;  %v38_v20 = vld [vmem:[%s566_s0] sm:$0xff]  ;;  %v40_v22 = vld [vmem:[%s566_s0 + $0x10] sm:$0xff]  ;;  %v180_v27 = vld [vmem:[%s568_s1 + $0x48] sm:$0xff] }
   0x6   :  { %96 = vmatpush1.bf16.msra.mxu0 %v58_v10  ;;  %v42_v21 = vld [vmem:[%s566_s0 + $0x20] sm:$0xff]  ;;  %v44_v24 = vld [vmem:[%s566_s0 + $0x30] sm:$0xff]  ;;  %v184_v28 = vld [vmem:[%s568_s1 + $0x68] sm:$0xff] }
   0x7   :  { %139 = vmatpush1.bf16.msra.mxu1 %v60_v14  ;;  %v54_v23 = vpack.c.bf16 %v42_v21, %v38_v20  ;;  %97 = vmatprep.subr.bf16.mxu0 %v55_v18  ;;  %v56_v25 = vpack.c.bf16 %v44_v24, %v40_v22  ;;  %v407_v26 = vld [vmem:[%s567_s2] sm:$0xff]   ;;  %v192_v29 = vpack.c.bf16 %v184_v28, %v180_v27  ;;  %v182_v30 = vld [vmem:[%s568_s1 + $0x58] sm:$0xff]  ;;  %v181_v35 = vld [vmem:[%s568_s1 + $0x50] sm:$0xff] }
   0x8   :  { %140 = vmatprep.subr.bf16.mxu1 %v57_v19  ;;  %v186_v31 = vld [vmem:[%s568_s1 + $0x78] sm:$0xff]  ;;  %v179_v32 = vld [vmem:[%s568_s1 + $0x40] sm:$0xff]  ;;  %v185_v36 = vld [vmem:[%s568_s1 + $0x70] sm:$0xff] }
   0x9   :  { %v194_v33 = vpack.c.bf16 %v186_v31, %v182_v30  ;;  %v183_v34 = vld [vmem:[%s568_s1 + $0x60] sm:$0xff]  ;;  %v193_v38 = vpack.c.bf16 %v185_v36, %v181_v35  ;;  %v172_v39 = vld [vmem:[%s568_s1 + $0x8] sm:$0xff]  ;;  %v174_v41 = vld [vmem:[%s568_s1 + $0x18] sm:$0xff] }
   0xa   :  { %98 = vmatpush1.bf16.msra.mxu0 %v54_v23  ;;  %v191_v37 = vpack.c.bf16 %v183_v34, %v179_v32  ;;  %v176_v40 = vld [vmem:[%s568_s1 + $0x28] sm:$0xff]  ;;  %v178_v43 = vld [vmem:[%s568_s1 + $0x38] sm:$0xff]  ;;  %v171_v44 = vld [vmem:[%s568_s1] sm:$0xff] }
   0xb   :  { %141 = vmatpush1.bf16.msra.mxu1 %v56_v25  ;;  %223 = vmatprep.subr.bf16.mxu0 %v192_v29  ;;  %v188_v42 = vpack.c.bf16 %v176_v40, %v172_v39  ;;  %v175_v45 = vld [vmem:[%s568_s1 + $0x20] sm:$0xff]  ;;  %v190_v46 = vpack.c.bf16 %v178_v43, %v174_v41  ;;  %v173_v47 = vld [vmem:[%s568_s1 + $0x10] sm:$0xff]  ;;  %v63_v53 = vld [vmem:[%s569_s4 + $0x8] sm:$0xff] }
   0xc   :  { %266 = vmatprep.subr.bf16.mxu1 %v194_v33  ;;  %v177_v48 = vld [vmem:[%s568_s1 + $0x30] sm:$0xff]  ;;  %v187_v49 = vpack.c.bf16 %v175_v45, %v171_v44  ;;  %v62_v50 = vld [vmem:[%s569_s4] sm:$0xff] }
   0xd   :  { %397 = vmatmul.mubr.msk.bf16.vlgmr.msra.gmra.mxu0 %vm79_vm0, %v407_v26  ;;  %v189_v51 = vpack.c.bf16 %v177_v48, %v173_v47  ;;  %v408_v52 = vld [vmem:[%s570_s3] sm:$0xff]   ;;  %66 = vperm.xlu0 %404, %v62_v50  }
   0xe   :  { %398 = vmatmul.mubr.msk.bf16.vlgmr.msra.gmra.mxu1 %vm79_vm0, %v407_v26  ;;  %224 = vmatpush1.bf16.msra.mxu0 %v191_v37 }
   0xf   :  { %267 = vmatpush1.bf16.msra.mxu1 %v193_v38  ;;  %225 = vmatprep.subr.bf16.mxu0 %v188_v42 }
  0x10   :  { %268 = vmatprep.subr.bf16.mxu1 %v190_v46  ;;  %243 = vmatprep.mubr.bf16.mxu0 %v409_v3 }
  0x11   :  { %286 = vmatprep.mubr.bf16.mxu1 %v409_v3  ;;  %196 = vperm.xlu1 %405, %v62_v50  }
  0x12   :  { %226 = vmatpush1.bf16.msra.mxu0 %v187_v49  ;;  %71 = vperm.xlu0 %404, %v63_v53  }
  0x13   :  { %269 = vmatpush1.bf16.msra.mxu1 %v189_v51 }
  0x15   :  { %400 = vmatmul.mubr.msk.bf16.vlgmr.msra.gmra.mxu0 %vm79_vm0, %v408_v52  ;;  %200 = vperm.xlu1 %405, %v63_v53  }
  0x16   :  { %401 = vmatmul.mubr.msk.bf16.vlgmr.msra.gmra.mxu1 %vm79_vm0, %v408_v52  ;;  %406 = vset.pattern.permute.xlu0 %v410_v8 }
  0x88   :  { %v67_v54 = vpop.permute.xlu0 %66 }
  0x8c   :  { %v197_v7 = vpop.permute.xlu1 %196 }
  0x8d   :  { %v72_v62 = vpop.permute.xlu0 %71 }
  0x90   :  { %v201_v32 = vpop.permute.xlu1 %200 }
  0xcd   :  { %v117_v55 = vpop.f32.mrf.mxu0 }
  0xce   :  { %v118_v56 = vadd.f32 %v117_v55, %v67_v54  ;;  %v160_v57 = vpop.f32.mrf.mxu1 }
  0xcf   :  { %v119_v58 = vpop.f32.mrf.mxu0  ;;  %v161_v61 = vadd.f32 %v160_v57, %v67_v54 }
  0xd0   :  { %v120_v59 = vadd.f32 %v119_v58, %v67_v54  ;;  %v162_v60 = vpop.f32.mrf.mxu1  ;;  %v331_v0 = vmul.f32 %v118_v56, %v118_v56 }
  0xd1   :  { %v121_v63 = vpop.f32.mrf.mxu0  ;;  %v163_v5 = vadd.f32 %v162_v60, %v67_v54  ;;  %v333_v12 = vmul.f32 %v161_v61, %v161_v61 }
  0xd2   :  { %v321_v1 = vadd.f32 %v120_v59, %v118_v56  ;;  %v332_v2 = vmul.f32 %v120_v59, %v120_v59  ;;  %v122_v3 = vadd.f32 %v121_v63, %v72_v62  ;;  %v164_v4 = vpop.f32.mrf.mxu1 }
  0xd3   :  { %v123_v6 = vpop.f32.mrf.mxu0  ;;  %v165_v14 = vadd.f32 %v164_v4, %v72_v62  ;;  %v334_v21 = vmul.f32 %v163_v5, %v163_v5 }
  0xd4   :  { %v339_v9 = vadd.f32 %v332_v2, %v331_v0  ;;  %v124_v8 = vadd.f32 %v123_v6, %v72_v62  ;;  %v166_v10 = vpop.f32.mrf.mxu1  ;;  %v322_v11 = vadd.f32 %v321_v1, %v161_v61  ;;  %v335_v13 = vmul.f32 %v122_v3, %v122_v3 }
  0xd5   :  { %v245_v15 = vpop.f32.mrf.mxu0  ;;  %v167_v22 = vadd.f32 %v166_v10, %v72_v62  ;;  %v337_v29 = vmul.f32 %v165_v14, %v165_v14 }
  0xd6   :  { %v326_v16 = vadd.f32 %v124_v8, %v122_v3  ;;  %v336_v17 = vmul.f32 %v124_v8, %v124_v8  ;;  %v246_v18 = vadd.f32 %v245_v15, %v197_v7  ;;  %v288_v19 = vpop.f32.mrf.mxu1  ;;  %v323_v20 = vadd.f32 %v322_v11, %v163_v5 }
  0xd7   :  { %v247_v23 = vpop.f32.mrf.mxu0  ;;  %v340_v24 = vadd.f32 %v339_v9, %v333_v12  ;;  %v289_v31 = vadd.f32 %v288_v19, %v197_v7  ;;  %v338_v40 = vmul.f32 %v167_v22, %v167_v22 }
  0xd8   :  { %v344_v25 = vadd.f32 %v336_v17, %v335_v13  ;;  %v248_v26 = vadd.f32 %v247_v23, %v197_v7  ;;  %v290_v27 = vpop.f32.mrf.mxu1  ;;  %324 = vadd.xlane.f32.xlu0 %v323_v20  ;;  %v327_v28 = vadd.f32 %v326_v16, %v165_v14  ;;  %v359_v30 = vmul.f32 %v246_v18, %v246_v18 }
  0xd9   :  { %v249_v33 = vpop.f32.mrf.mxu0  ;;  %v341_v34 = vadd.f32 %v340_v24, %v334_v21  ;;  %v361_v46 = vmul.f32 %v289_v31, %v289_v31  ;;  %v291_v47 = vadd.f32 %v290_v27, %v197_v7 }
  0xda   :  { %v349_v35 = vadd.f32 %v248_v26, %v246_v18  ;;  %v360_v36 = vmul.f32 %v248_v26, %v248_v26  ;;  %v250_v37 = vadd.f32 %v249_v33, %v201_v32  ;;  %v292_v38 = vpop.f32.mrf.mxu1  ;;  %v328_v39 = vadd.f32 %v327_v28, %v167_v22 }
  0xdb   :  { %v251_v41 = vpop.f32.mrf.mxu0  ;;  %v345_v42 = vadd.f32 %v344_v25, %v337_v29  ;;  %v293_v44 = vadd.f32 %v292_v38, %v201_v32  ;;  %v362_v60 = vmul.f32 %v291_v47, %v291_v47 }
  0xdc   :  { %v367_v43 = vadd.f32 %v360_v36, %v359_v30  ;;  %v252_v45 = vadd.f32 %v251_v41, %v201_v32  ;;  %329 = vadd.xlane.f32.xlu1 %v328_v39  ;;  %342 = vadd.xlane.f32.xlu0 %v341_v34  ;;  %v294_v48 = vpop.f32.mrf.mxu1  ;;  %v350_v49 = vadd.f32 %v349_v35, %v289_v31 }
  0xdd   :  { %v363_v50 = vmul.f32 %v250_v37, %v250_v37  ;;  %v346_v53 = vadd.f32 %v345_v42, %v338_v40  ;;  %v365_v56 = vmul.f32 %v293_v44, %v293_v44  ;;  %v295_v58 = vadd.f32 %v294_v48, %v201_v32 }
  0xde   :  { %v354_v51 = vadd.f32 %v252_v45, %v250_v37  ;;  %v364_v52 = vmul.f32 %v252_v45, %v252_v45  ;;  %v351_v54 = vadd.f32 %v350_v49, %v291_v47  ;;  %v368_v55 = vadd.f32 %v367_v43, %v361_v46 }
  0xdf   :  { %v366_v0 = vmul.f32 %v295_v58, %v295_v58 }
  0xe0   :  { %v372_v57 = vadd.f32 %v364_v52, %v363_v50  ;;  %347 = vadd.xlane.f32.xlu0 %v346_v53  ;;  %v355_v59 = vadd.f32 %v354_v51, %v293_v44  ;;  %352 = vadd.xlane.f32.xlu1 %v351_v54  ;;  %v369_v63 = vadd.f32 %v368_v55, %v362_v60 }
  0xe2   :  { %v356_v61 = vadd.f32 %v355_v59, %v295_v58  ;;  %v373_v62 = vadd.f32 %v372_v57, %v365_v56 }
  0xe4   :  { %357 = vadd.xlane.f32.xlu0 %v356_v61  ;;  %370 = vadd.xlane.f32.xlu1 %v369_v63  ;;  %v374_v1 = vadd.f32 %v373_v62, %v366_v0 }
  0xe8   :  { %375 = vadd.xlane.f32.xlu0 %v374_v1 }
 0x161   :  { %v325_v2 = vpop.xlane.xlu0 %324 }
 0x165   :  { %v330_v3 = vpop.xlane.xlu1 %329  ;;  %v343_v4 = vpop.xlane.xlu0 %342 }
 0x166   :  { %v378_v7 = vsel %vm377_vm1, %v325_v2, %v343_v4 }
 0x169   :  { %v348_v5 = vpop.xlane.xlu0 %347  ;;  %v353_v6 = vpop.xlane.xlu1 %352 }
 0x16a   :  { %v381_v8 = vsel %vm380_vm2, %v378_v7, %v353_v6  ;;  %v379_v12 = vsel %vm377_vm1, %v330_v3, %v348_v5 }
 0x16d   :  { %v358_v9 = vpop.xlane.xlu0 %357  ;;  %v371_v10 = vpop.xlane.xlu1 %370 }
 0x16e   :  { %v384_v11 = vsel %vm383_vm3, %v381_v8, %v371_v10  ;;  %v382_v14 = vsel %vm380_vm2, %v379_v12, %v358_v9 }
 0x16f   :  { %v387_v13 = vsel %vm386_vm4, %v384_v11, 0.0 }
 0x170   :  { %390 = vst.msk [vmem:[%s571_s5] sm:$0xff] %vm389_vm5, %v387_v13 }
 0x171   :  { %v376_v15 = vpop.xlane.xlu0 %375 }
 0x172   :  { %v385_v16 = vsel %vm383_vm3, %v382_v14, %v376_v15 }
 0x173   :  { %v388_v17 = vsel %vm386_vm4, %v385_v16, 0.0 }
 0x174   :  { %391 = vst.msk [vmem:[%s571_s5 + $0x8] sm:$0xff] %vm389_vm5, %v388_v17 }

// kernel: attention_block_forward.4
= control target key start
LH: loop header
LB: loop body
LE: loop exit
PB: predicated region body
PF: predicated region fallthrough
CT: control target
= control target key end

     0   :  { %v538_v3 = vmov 0   ;;  %v539_v8 = vmov 1   ;;  %vm81_vm0 = vcmask 261120   ;;  %v540_v54 = vmov 2   ;;  %s722_s0 = inlined_call_operand.vmem [shape: f32[32,512], index: 0, kind: input, shape index: {}]   ;;  %s723_s2 = inlined_call_operand.vmem [shape: bf16[16,32], index: 2, kind: input, shape index: {}]   ;;  %s724_s1 = inlined_call_operand.vmem [shape: f32[32,512], index: 1, kind: input, shape index: {}]   ;;  %s725_s4 = inlined_call_operand.vmem [shape: f32[16,8], index: 4, kind: input, shape index: {}]   ;;  %s726_s3 = inlined_call_operand.vmem [shape: bf16[16,32], index: 3, kind: input, shape index: {}]   ;;  %s727_s5 = inlined_call_operand.vmem [shape: f32[1,512], index: 5, kind: output, shape index: {0}]   ;;  %s728_s6 = inlined_call_operand.vmem [shape: f32[1,1,8], index: 6, kind: output, shape index: {1}]  }
   0x1   :  { %v49_v0 = vld [vmem:[%s722_s0 + $0x48] sm:$0xff]  ;;  %v51_v2 = vld [vmem:[%s722_s0 + $0x58] sm:$0xff]  ;;  %117 = vmatprep.mubr.bf16.mxu0 %v538_v3  ;;  %160 = vmatprep.mubr.bf16.mxu1 %v538_v3  ;;  %v48_v6 = vld [vmem:[%s722_s0 + $0x40] sm:$0xff]  ;;  %v541_v55 = vmov 4   ;;  %v542_v56 = vmov 3   ;;  %v543_v57 = vmov 5  }
   0x2   :  { %v53_v1 = vld [vmem:[%s722_s0 + $0x68] sm:$0xff]  ;;  %v55_v5 = vld [vmem:[%s722_s0 + $0x78] sm:$0xff]  ;;  %v52_v7 = vld [vmem:[%s722_s0 + $0x60] sm:$0xff]  ;;  %524 = vset.pattern.permute.xlu1 %v539_v8  ;;  %523 = vset.pattern.permute.xlu0 %v538_v3  ;;  %v544_v58 = vmov 6   ;;  %v545_v59 = vmov 7   ;;  %vm471_vm1 = vcmask 1040384  }
   0x3   :  { %v61_v4 = vpack.c.bf16 %v53_v1, %v49_v0  ;;  %v63_v9 = vpack.c.bf16 %v55_v5, %v51_v2  ;;  %v60_v10 = vpack.c.bf16 %v52_v7, %v48_v6  ;;  %v50_v11 = vld [vmem:[%s722_s0 + $0x50] sm:$0xff]  ;;  %v41_v13 = vld [vmem:[%s722_s0 + $0x8] sm:$0xff]  ;;  %v43_v16 = vld [vmem:[%s722_s0 + $0x18] sm:$0xff]  ;;  %vm494_vm3 = vcmask 7168  }
   0x4   :  { %v54_v12 = vld [vmem:[%s722_s0 + $0x70] sm:$0xff]  ;;  %v45_v15 = vld [vmem:[%s722_s0 + $0x28] sm:$0xff]  ;;  %v47_v17 = vld [vmem:[%s722_s0 + $0x38] sm:$0xff]  ;;  %vm496_vm4 = vcmask 15360   ;;  %vm498_vm5 = vcmask 57344  }
   0x5   :  { %97 = vmatprep.subr.bf16.mxu0 %v61_v4  ;;  %v62_v14 = vpack.c.bf16 %v54_v12, %v50_v11  ;;  %140 = vmatprep.subr.bf16.mxu1 %v63_v9  ;;  %v57_v18 = vpack.c.bf16 %v45_v15, %v41_v13  ;;  %v59_v19 = vpack.c.bf16 %v47_v17, %v43_v16  ;;  %v40_v20 = vld [vmem:[%s722_s0] sm:$0xff]  ;;  %v42_v22 = vld [vmem:[%s722_s0 + $0x10] sm:$0xff]  ;;  %v182_v27 = vld [vmem:[%s724_s1 + $0x48] sm:$0xff] }
   0x6   :  { %98 = vmatpush1.bf16.msra.mxu0 %v60_v10  ;;  %v44_v21 = vld [vmem:[%s722_s0 + $0x20] sm:$0xff]  ;;  %v46_v24 = vld [vmem:[%s722_s0 + $0x30] sm:$0xff]  ;;  %v186_v28 = vld [vmem:[%s724_s1 + $0x68] sm:$0xff] }
   0x7   :  { %141 = vmatpush1.bf16.msra.mxu1 %v62_v14  ;;  %v56_v23 = vpack.c.bf16 %v44_v21, %v40_v20  ;;  %99 = vmatprep.subr.bf16.mxu0 %v57_v18  ;;  %v58_v25 = vpack.c.bf16 %v46_v24, %v42_v22  ;;  %v536_v26 = vld [vmem:[%s723_s2] sm:$0xff]   ;;  %v194_v29 = vpack.c.bf16 %v186_v28, %v182_v27  ;;  %v184_v30 = vld [vmem:[%s724_s1 + $0x58] sm:$0xff]  ;;  %v183_v35 = vld [vmem:[%s724_s1 + $0x50] sm:$0xff] }
   0x8   :  { %142 = vmatprep.subr.bf16.mxu1 %v59_v19  ;;  %v188_v31 = vld [vmem:[%s724_s1 + $0x78] sm:$0xff]  ;;  %v181_v32 = vld [vmem:[%s724_s1 + $0x40] sm:$0xff]  ;;  %v187_v36 = vld [vmem:[%s724_s1 + $0x70] sm:$0xff] }
   0x9   :  { %v196_v33 = vpack.c.bf16 %v188_v31, %v184_v30  ;;  %v185_v34 = vld [vmem:[%s724_s1 + $0x60] sm:$0xff]  ;;  %v195_v38 = vpack.c.bf16 %v187_v36, %v183_v35  ;;  %v174_v39 = vld [vmem:[%s724_s1 + $0x8] sm:$0xff]  ;;  %v176_v41 = vld [vmem:[%s724_s1 + $0x18] sm:$0xff] }
   0xa   :  { %100 = vmatpush1.bf16.msra.mxu0 %v56_v23  ;;  %v193_v37 = vpack.c.bf16 %v185_v34, %v181_v32  ;;  %v178_v40 = vld [vmem:[%s724_s1 + $0x28] sm:$0xff]  ;;  %v180_v43 = vld [vmem:[%s724_s1 + $0x38] sm:$0xff]  ;;  %v173_v44 = vld [vmem:[%s724_s1] sm:$0xff] }
   0xb   :  { %143 = vmatpush1.bf16.msra.mxu1 %v58_v25  ;;  %225 = vmatprep.subr.bf16.mxu0 %v194_v29  ;;  %v190_v42 = vpack.c.bf16 %v178_v40, %v174_v39  ;;  %v177_v45 = vld [vmem:[%s724_s1 + $0x20] sm:$0xff]  ;;  %v192_v46 = vpack.c.bf16 %v180_v43, %v176_v41  ;;  %v175_v47 = vld [vmem:[%s724_s1 + $0x10] sm:$0xff]  ;;  %v65_v53 = vld [vmem:[%s725_s4 + $0x8] sm:$0xff] }
   0xc   :  { %268 = vmatprep.subr.bf16.mxu1 %v196_v33  ;;  %v179_v48 = vld [vmem:[%s724_s1 + $0x30] sm:$0xff]  ;;  %v189_v49 = vpack.c.bf16 %v177_v45, %v173_v44  ;;  %v64_v50 = vld [vmem:[%s725_s4] sm:$0xff] }
   0xd   :  { %509 = vmatmul.mubr.msk.bf16.vlgmr.msra.gmra.mxu0 %vm81_vm0, %v536_v26  ;;  %v191_v51 = vpack.c.bf16 %v179_v48, %v175_v47  ;;  %v537_v52 = vld [vmem:[%s726_s3] sm:$0xff]   ;;  %198 = vperm.xlu1 %524, %v64_v50  }
   0xe   :  { %510 = vmatmul.mubr.msk.bf16.vlgmr.msra.gmra.mxu1 %vm81_vm0, %v536_v26  ;;  %226 = vmatpush1.bf16.msra.mxu0 %v193_v37  ;;  %v423_v60 = vld [vmem:[%s725_s4] sm:$0x1] }
   0xf   :  { %269 = vmatpush1.bf16.msra.mxu1 %v195_v38  ;;  %227 = vmatprep.subr.bf16.mxu0 %v190_v42 }
  0x10   :  { %270 = vmatprep.subr.bf16.mxu1 %v192_v46  ;;  %245 = vmatprep.mubr.bf16.mxu0 %v538_v3 }
  0x11   :  { %288 = vmatprep.mubr.bf16.mxu1 %v538_v3  ;;  %68 = vperm.xlu0 %523, %v64_v50  }
  0x12   :  { %228 = vmatpush1.bf16.msra.mxu0 %v189_v49  ;;  %202 = vperm.xlu1 %524, %v65_v53  }
  0x13   :  { %271 = vmatpush1.bf16.msra.mxu1 %v191_v51 }
  0x15   :  { %512 = vmatmul.mubr.msk.bf16.vlgmr.msra.gmra.mxu0 %vm81_vm0, %v537_v52  ;;  %73 = vperm.xlu0 %523, %v65_v53  }
  0x16   :  { %513 = vmatmul.mubr.msk.bf16.vlgmr.msra.gmra.mxu1 %vm81_vm0, %v537_v52  ;;  %526 = vset.pattern.permute.xlu1 %v540_v54 }
  0x17   :  { %304 = vperm.xlu1 %526, %v65_v53  }
  0x19   :  { %525 = vset.pattern.permute.xlu0 %v540_v54 }
  0x1a   :  { %300 = vperm.xlu0 %525, %v64_v50  }
  0x1b   :  { %527 = vset.pattern.permute.xlu1 %v541_v55 }
  0x1c   :  { %332 = vperm.xlu1 %527, %v64_v50  }
  0x1e   :  { %528 = vset.pattern.permute.xlu0 %v541_v55 }
  0x1f   :  { %336 = vperm.xlu0 %528, %v65_v53  }
  0x20   :  { %529 = vset.pattern.permute.xlu1 %v542_v56 }
  0x21   :  { %316 = vperm.xlu1 %529, %v64_v50  }
  0x23   :  { %530 = vset.pattern.permute.xlu0 %v543_v57 }
  0x24   :  { %348 = vperm.xlu0 %530, %v64_v50  }
  0x25   :  { %320 = vperm.xlu1 %529, %v65_v53  }
  0x28   :  { %533 = vset.pattern.permute.xlu0 %v544_v58 }
  0x29   :  { %384 = vperm.xlu0 %533, %v65_v53   ;;  %531 = vset.pattern.permute.xlu1 %v543_v57 }
  0x2a   :  { %352 = vperm.xlu1 %531, %v65_v53  }
  0x2d   :  { %535 = vset.pattern.permute.xlu0 %v545_v59 }
  0x2e   :  { %532 = vset.pattern.permute.xlu1 %v544_v58 }
  0x2f   :  { %380 = vperm.xlu1 %532, %v64_v50  }
  0x33   :  { %534 = vset.pattern.permute.xlu1 %v545_v59 }
  0x34   :  { %426 = vperm.xlu1 %534, %v423_v60  }
  0x88   :  { %v199_v61 = vpop.permute.xlu1 %198 }
  0x8c   :  { %v69_v62 = vpop.permute.xlu0 %68 }
  0x8d   :  { %v702_v63 = vpop.permute.xlu1 %202 }
  0x90   :  { %v74_v1 = vpop.permute.xlu0 %73 }
  0x92   :  { %v305_v0 = vpop.permute.xlu1 %304 }
  0x95   :  { %v301_v3 = vpop.permute.xlu0 %300 }
  0x97   :  { %v333_v2 = vpop.permute.xlu1 %332 }
  0x9a   :  { %v337_v11 = vpop.permute.xlu0 %336 }
  0x9c   :  { %v317_v13 = vpop.permute.xlu1 %316 }
  0x9f   :  { %v349_v28 = vpop.permute.xlu0 %348 }
  0xa0   :  { %v321_v32 = vpop.permute.xlu1 %320 }
  0xa5   :  { %v353_v54 = vpop.permute.xlu1 %352 }
  0xcd   :  { %v119_v4 = vpop.f32.mrf.mxu0 }
  0xce   :  { %v162_v5 = vpop.f32.mrf.mxu1  ;;  %v120_v6 = vadd.f32 %v119_v4, %v69_v62 }
  0xcf   :  { %v163_v7 = vadd.f32 %v162_v5, %v69_v62  ;;  %v121_v8 = vpop.f32.mrf.mxu0 }
  0xd0   :  { %v122_v9 = vadd.f32 %v121_v8, %v69_v62  ;;  %v164_v10 = vpop.f32.mrf.mxu1  ;;  %v307_v16 = vmul.f32 %v301_v3, %v120_v6 }
  0xd1   :  { %v165_v12 = vadd.f32 %v164_v10, %v69_v62  ;;  %v123_v14 = vpop.f32.mrf.mxu0  ;;  %v309_v17 = vmul.f32 %v301_v3, %v163_v7 }
  0xd2   :  { %v166_v15 = vpop.f32.mrf.mxu1  ;;  %v308_v19 = vmul.f32 %v301_v3, %v122_v9  ;;  %v124_v20 = vadd.f32 %v123_v14, %v74_v1  ;;  %v323_v29 = vadd.f32 %v317_v13, %v307_v16 }
  0xd3   :  { %v125_v18 = vpop.f32.mrf.mxu0  ;;  %v310_v22 = vmul.f32 %v301_v3, %v165_v12  ;;  %v167_v23 = vadd.f32 %v166_v15, %v74_v1  ;;  %v325_v30 = vadd.f32 %v317_v13, %v309_v17 }
  0xd4   :  { %v168_v21 = vpop.f32.mrf.mxu1  ;;  %v126_v25 = vadd.f32 %v125_v18, %v74_v1  ;;  %v324_v35 = vadd.f32 %v317_v13, %v308_v19  ;;  %v311_v36 = vmul.f32 %v305_v0, %v124_v20  ;;  %v381_v18 = vpop.permute.xlu1 %380 }
  0xd5   :  { %v247_v24 = vpop.f32.mrf.mxu0  ;;  %v169_v31 = vadd.f32 %v168_v21, %v74_v1  ;;  %v326_v40 = vadd.f32 %v317_v13, %v310_v22  ;;  %v313_v41 = vmul.f32 %v305_v0, %v167_v23  ;;  %v385_v20 = vpop.permute.xlu0 %384 }
  0xd6   :  { %v248_v26 = vadd.f32 %v247_v24, %v199_v61  ;;  %v290_v27 = vpop.f32.mrf.mxu1  ;;  %v312_v45 = vmul.f32 %v305_v0, %v126_v25  ;;  %v327_v4 = vadd.f32 %v321_v32, %v311_v36 }
  0xd7   :  { %v291_v33 = vadd.f32 %v290_v27, %v199_v61  ;;  %v249_v34 = vpop.f32.mrf.mxu0  ;;  %v314_v50 = vmul.f32 %v305_v0, %v169_v31  ;;  %v329_v6 = vadd.f32 %v321_v32, %v313_v41 }
  0xd8   :  { %v339_v37 = vmul.f32 %v333_v2, %v248_v26  ;;  %v250_v38 = vadd.f32 %v249_v34, %v199_v61  ;;  %v292_v39 = vpop.f32.mrf.mxu1  ;;  %v328_v10 = vadd.f32 %v321_v32, %v312_v45 }
  0xd9   :  { %v341_v42 = vmul.f32 %v333_v2, %v291_v33  ;;  %v293_v43 = vadd.f32 %v292_v39, %v199_v61  ;;  %v251_v44 = vpop.f32.mrf.mxu0  ;;  %v330_v15 = vadd.f32 %v321_v32, %v314_v50 }
  0xda   :  { %v340_v46 = vmul.f32 %v333_v2, %v250_v38  ;;  %v355_v47 = vadd.f32 %v349_v28, %v339_v37  ;;  %v252_v48 = vadd.f32 %v251_v44, %v702_v63  ;;  %v294_v49 = vpop.f32.mrf.mxu1 }
  0xdb   :  { %v342_v51 = vmul.f32 %v333_v2, %v293_v43  ;;  %v357_v52 = vadd.f32 %v349_v28, %v341_v42  ;;  %v295_v53 = vadd.f32 %v294_v49, %v702_v63  ;;  %v253_v55 = vpop.f32.mrf.mxu0  ;;  %v546_v49 = vmov 1966171168  }
  0xdc   :  { %v356_v56 = vadd.f32 %v349_v28, %v340_v46  ;;  %v363_v57 = vadd.f32 %v355_v47, %v323_v29  ;;  %v343_v58 = vmul.f32 %v337_v11, %v252_v48  ;;  %v254_v59 = vadd.f32 %v253_v55, %v702_v63  ;;  %v296_v60 = vpop.f32.mrf.mxu1 }
  0xdd   :  { %v358_v61 = vadd.f32 %v349_v28, %v342_v51  ;;  %v365_v62 = vadd.f32 %v357_v52, %v325_v30  ;;  %v345_v1 = vmul.f32 %v337_v11, %v295_v53  ;;  %v297_v3 = vadd.f32 %v296_v60, %v702_v63 }
  0xde   :  { %v364_v5 = vadd.f32 %v356_v56, %v324_v35  ;;  %v359_v0 = vadd.f32 %v353_v54, %v343_v58  ;;  %v344_v2 = vmul.f32 %v337_v11, %v254_v59  ;;  %v371_v14 = vmax.f32 %v363_v57, 0.0  ;;  %v427_v58 = vpop.permute.xlu1 %426 }
  0xdf   :  { %v366_v7 = vadd.f32 %v358_v61, %v326_v40  ;;  %v361_v8 = vadd.f32 %v353_v54, %v345_v1  ;;  %v346_v9 = vmul.f32 %v337_v11, %v297_v3  ;;  %v373_v19 = vmax.f32 %v365_v62, 0.0 }
  0xe0   :  { %v367_v12 = vadd.f32 %v359_v0, %v327_v4  ;;  %v360_v13 = vadd.f32 %v353_v54, %v344_v2  ;;  %v372_v63 = vmax.f32 %v364_v5, 0.0  ;;  %v387_v27 = vmul.f32 %v381_v18, %v371_v14 }
  0xe1   :  { %v369_v16 = vadd.f32 %v361_v8, %v329_v6  ;;  %v362_v17 = vadd.f32 %v353_v54, %v346_v9  ;;  %v374_v24 = vmax.f32 %v366_v7, 0.0  ;;  %v389_v29 = vmul.f32 %v381_v18, %v373_v19 }
  0xe2   :  { %v368_v21 = vadd.f32 %v360_v13, %v328_v10  ;;  %v375_v22 = vmax.f32 %v367_v12, 0.0  ;;  %v388_v31 = vmul.f32 %v381_v18, %v372_v63  ;;  %v440_v50 = vunpack.c.l.s4 %v546_v49 }
  0xe3   :  { %v370_v23 = vadd.f32 %v362_v17, %v330_v15  ;;  %v377_v25 = vmax.f32 %v369_v16, 0.0  ;;  %v390_v34 = vmul.f32 %v381_v18, %v374_v24  ;;  %v442_v51 = vlaneseq }
  0xe4   :  { %v376_v26 = vmax.f32 %v368_v21, 0.0  ;;  %v391_v28 = vmul.f32 %v385_v20, %v375_v22  ;;  %v441_v61 = vunpack.c.0.s8 %v440_v50 }
  0xe5   :  { %v378_v11 = vmax.f32 %v370_v23, 0.0  ;;  %v393_v30 = vmul.f32 %v385_v20, %v377_v25  ;;  %v443_v62 = vshrl.u32 %v442_v51, 7  ;;  %vm464_vm2 = vcmp.lt.s32.totalorder %v442_v51, 512 }
  0xe6   :  { %v392_v33 = vmul.f32 %v385_v20, %v376_v26  ;;  %v395_v32 = vadd.f32 %v391_v28, %v387_v27 }
  0xe7   :  { %v394_v35 = vmul.f32 %v385_v20, %v378_v11  ;;  %v409_v36 = vadd.f32 %v393_v30, %v389_v29  ;;  %v444_v8 = vsub.s32 %v441_v61, %v443_v62 }
  0xe8   :  { %v396_v37 = vrot.slane %v395_v32, 4  ;;  %v402_v38 = vadd.f32 %v392_v33, %v388_v31 }
  0xe9   :  { %v410_v39 = vrot.slane %v409_v36, 4  ;;  %v416_v40 = vadd.f32 %v394_v35, %v390_v34 }
  0xea   :  { %v397_v41 = vadd.f32 %v396_v37, %v395_v32  ;;  %v403_v42 = vrot.slane %v402_v38, 4 }
  0xeb   :  { %v411_v43 = vadd.f32 %v410_v39, %v409_v36  ;;  %v417_v44 = vrot.slane %v416_v40, 4 }
  0xec   :  { %v404_v45 = vadd.f32 %v403_v42, %v402_v38  ;;  %v398_v46 = vrot.slane %v397_v41, 2 }
  0xed   :  { %v418_v47 = vadd.f32 %v417_v44, %v416_v40  ;;  %v412_v48 = vrot.slane %v411_v43, 2 }
  0xee   :  { %v399_v52 = vadd.f32 %v398_v46, %v397_v41  ;;  %v405_v53 = vrot.slane %v404_v45, 2 }
  0xef   :  { %v413_v54 = vadd.f32 %v412_v48, %v411_v43  ;;  %v419_v55 = vrot.slane %v418_v47, 2 }
  0xf0   :  { %v400_v56 = vrot.slane %v399_v52, 1  ;;  %v406_v57 = vadd.f32 %v405_v53, %v404_v45 }
  0xf1   :  { %v414_v59 = vrot.slane %v413_v54, 1  ;;  %v420_v60 = vadd.f32 %v419_v55, %v418_v47 }
  0xf2   :  { %v401_v1 = vadd.f32 %v400_v56, %v399_v52  ;;  %v407_v3 = vrot.slane %v406_v57, 1 }
  0xf3   :  { %v415_v4 = vadd.f32 %v414_v59, %v413_v54  ;;  %v421_v5 = vrot.slane %v420_v60, 1 }
  0xf4   :  { %v408_v0 = vadd.f32 %v407_v3, %v406_v57  ;;  %v429_v2 = vadd.f32 %v427_v58, %v401_v1 }
  0xf5   :  { %v422_v6 = vadd.f32 %v421_v5, %v420_v60  ;;  %v431_v7 = vadd.f32 %v427_v58, %v415_v4 }
  0xf6   :  { %v430_v9 = vadd.f32 %v427_v58, %v408_v0  ;;  %v481_v10 = vmul.f32 %v429_v2, %v429_v2  ;;  %v472_v13 = vsel %vm471_vm1, %v429_v2, 0.0 }
  0xf7   :  { %v432_v12 = vadd.f32 %v427_v58, %v422_v6  ;;  %v483_v17 = vmul.f32 %v431_v7, %v431_v7  ;;  %v475_v20 = vsel %vm471_vm1, %v431_v7, 0.0 }
  0xf8   :  { %v437_v14 = vcombine.low %v429_v2, %v430_v9  ;;  %v473_v15 = vsel %vm471_vm1, %v430_v9, 0.0  ;;  %v482_v16 = vmul.f32 %v430_v9, %v430_v9  ;;  %v485_v22 = vsel %vm471_vm1, %v481_v10, 0.0 }
  0xf9   :  { %v438_v18 = vcombine.low %v431_v7, %v432_v12  ;;  %v474_v19 = vadd.f32 %v473_v15, %v472_v13  ;;  %v484_v63 = vmul.f32 %v432_v12, %v432_v12  ;;  %v477_v27 = vsel %vm471_vm1, %v432_v12, 0.0 }
  0xfa   :  { %v445_v21 = vrot.slane %v437_v14, %v444_v8  ;;  %v486_v23 = vsel %vm471_vm1, %v482_v16, 0.0  ;;  %v488_v28 = vsel %vm471_vm1, %v483_v17, 0.0 }
  0xfb   :  { %v452_v24 = vrot.slane %v438_v18, %v444_v8  ;;  %v476_v25 = vadd.f32 %v475_v20, %v474_v19  ;;  %v487_v26 = vadd.f32 %v486_v23, %v485_v22  ;;  %v490_v31 = vsel %vm471_vm1, %v484_v63, 0.0 }
  0xfd   :  { %v453_v11 = vcombine.low %v445_v21, %v452_v24  ;;  %v478_v29 = vadd.f32 %v477_v27, %v476_v25  ;;  %v489_v30 = vadd.f32 %v488_v28, %v487_v26 }
  0xff   :  { %v460_v33 = vrot.slane %v453_v11, %v444_v8  ;;  %479 = vadd.xlane.f32.xlu1 %v478_v29  ;;  %v491_v32 = vadd.f32 %v490_v31, %v489_v30 }
 0x101   :  { %466 = vst.msk [vmem:[%s727_s5] sm:$0xf] %vm464_vm2, %v460_v33  ;;  %492 = vadd.xlane.f32.xlu0 %v491_v32 }
 0x188   :  { %v480_v34 = vpop.xlane.xlu1 %479 }
 0x18a   :  { %v493_v35 = vpop.xlane.xlu0 %492 }
 0x18b   :  { %v495_v36 = vsel %vm494_vm3, %v480_v34, %v493_v35 }
 0x18c   :  { %v497_v37 = vsel %vm496_vm4, %v495_v36, 0.0 }
 0x18d   :  { %499 = vst.msk [vmem:[%s728_s6] sm:$0x1] %vm498_vm5, %v497_v37 }

</bundles_post_ra>
